<compile_context>
chip_gen: v6e
topology: v6e:2x2x1
jax: 0.10.0
libtpu: 0.0.40
codegen_flags: <defaults>
</compile_context>

<pallas_src>
import functools
import numpy as np
import jax
import jax.numpy as jnp
from jax.experimental import pallas as pl
from jax.experimental.pallas import tpu as pltpu


def _char_embedder_kernel(ids_ref, exp_ref, vcol_ref, bigk_ref, bias_ref,
                          out_ref, *, out_channels, conv_out_len):
    """One tile of TB words: fused gather + conv + max-pool + bias.

    ids_ref:  (TB, W)     int32  char ids for TB words
    exp_ref:  (W, W*V)    f32    static 0/1 expander (ids -> lane-dense keys)
    vcol_ref: (1, W*V)    f32    per-column compare target (v of column w*V+v)
    bigk_ref: (W*V, J*C)  bf16   embedding table folded into im2col conv weights
    bias_ref: (1, C)      f32    conv bias
    out_ref:  (TB, C)     f32    per-word char features
    """
    C, J = out_channels, conv_out_len

    ids_f = ids_ref[...].astype(jnp.float32)                 # (TB, W), exact ints
    # key[n, w*V + v] = ids[n, w]  -- tiny f32 MXU matmul (K = W), lane-dense,
    # exact for any vocab size (f32 integers), no narrow slices / broadcasts.
    key = jnp.dot(ids_f, exp_ref[...], preferred_element_type=jnp.float32)
    # Flattened one-hot in one full-width compare; 0/1 are exact in bf16.
    onehot = jnp.where(key == vcol_ref[...], 1.0, 0.0).astype(jnp.bfloat16)
    # Single big bf16 matmul performs gather + conv in one MXU pass
    # (f32 accumulation): acc[n, j*C + c] = conv output before bias.
    acc = jnp.dot(onehot, bigk_ref[...],
                  preferred_element_type=jnp.float32)        # (TB, J*C)

    # max-pool over the J conv output positions (static lane slices of width C)
    pooled = acc[:, 0:C]
    for j in range(1, J):
        pooled = jnp.maximum(pooled, acc[:, j * C:(j + 1) * C])

    out_ref[...] = (pooled + bias_ref[...]).astype(out_ref.dtype)


def fold_char_embedder_weights(table, conv_w, conv_b, *, word_len):
    """Fold nn.Embedding weight + im2col'd Conv2d weight into one bf16 matrix.

    Pure jnp (jit-safe); all index maps are static numpy built from shapes only.
    Returns (expander, vcol, big_kmat, bias2d).
    """
    V, D = table.shape
    C, cin, kD, k = conv_w.shape
    assert cin == 1 and kD == D
    W = int(word_len)
    assert k <= W, "char_channel_width must be <= word_len"
    J = W - k + 1
    WD, WV, JC = W * D, W * V, J * C

    # --- static index maps encoding torch's `.view(-1, D, W)` reinterpretation
    # kmat[w, d, j*C + c] = conv_w[c, 0, i, t]  where  i*W + j + t == w*D + d
    m = np.arange(WD)[:, None]          # flat char-image index  m = w*D + d
    jj = np.arange(J)[None, :]          # conv output position
    diff = m - jj                       # = i*W + t of the (unique) contributing tap
    i_idx = diff // W
    t_idx = diff % W
    valid = (diff >= 0) & (i_idx < D) & (t_idx < k)
    i_c = np.clip(i_idx, 0, D - 1)
    t_c = np.clip(t_idx, 0, k - 1)

    w2 = conv_w[:, 0].astype(jnp.float32)                     # (C, D, k)
    gathered = w2[:, i_c, t_c]                                 # (C, WD, J)
    kmat = jnp.where(jnp.asarray(valid)[None], gathered, 0.0)  # (C, WD, J)
    kmat = jnp.transpose(kmat, (1, 2, 0)).reshape(W, D, JC)    # (W, D, J*C)

    # Fold the embedding table:  big[w*V + v, :] = sum_d table[v, d] * kmat[w, d, :]
    big = jnp.einsum('vd,wdo->wvo', table.astype(jnp.float32), kmat)
    big_kmat = big.reshape(WV, JC).astype(jnp.bfloat16)        # bf16 MXU path

    # Static one-hot helpers: expander replicates ids[n, w] over the V lanes of
    # word w; vcol[0, w*V + v] = v is the per-column compare target.
    expander = jnp.asarray(
        np.kron(np.eye(W, dtype=np.float32), np.ones((1, V), np.float32)))
    vcol = jnp.asarray(np.tile(np.arange(V, dtype=np.float32), W)[None, :])

    bias2d = conv_b.astype(jnp.float32).reshape(1, C)
    return expander, vcol, big_kmat, bias2d


def char_embedder_forward(ids, expander, vcol, big_kmat, bias2d, *,
                          token_block=None):
    """Eval-mode forward of CharEmbedder using pre-folded weights.

    ids: (B, S, W) int char ids per word.  Returns (B, S, C) float32.
    """
    B, S, W = ids.shape
    WV = expander.shape[1]
    assert expander.shape[0] == W and WV % W == 0
    C = bias2d.shape[-1]
    JC = big_kmat.shape[-1]
    assert big_kmat.shape[0] == WV and JC % C == 0
    J = JC // C

    N = B * S
    if token_block is None:
        # Big tiles amortize per-step overhead, but keep >=2 grid steps so the
        # "parallel" axis can split across v7x's two TensorCores.
        TB = min(512, 8 * pl.cdiv(pl.cdiv(N, 2), 8))
    else:
        TB = int(token_block)
    assert TB % 8 == 0, "token tile must be a multiple of 8 sublanes"

    n_blocks = pl.cdiv(N, TB)
    n_pad = n_blocks * TB
    ids_flat = ids.reshape(N, W).astype(jnp.int32)
    if n_pad != N:
        ids_flat = jnp.pad(ids_flat, ((0, n_pad - N), (0, 0)))

    kernel = functools.partial(_char_embedder_kernel,
                               out_channels=C, conv_out_len=J)

    out = pl.pallas_call(
        kernel,
        out_shape=jax.ShapeDtypeStruct((n_pad, C), jnp.float32),
        grid_spec=pltpu.PrefetchScalarGridSpec(
            num_scalar_prefetch=0,
            grid=(n_blocks,),
            in_specs=[
                pl.BlockSpec((TB, W), lambda i: (i, 0)),    # char-id tile
                pl.BlockSpec((W, WV), lambda i: (0, 0)),    # expander, VMEM-resident
                pl.BlockSpec((1, WV), lambda i: (0, 0)),    # compare targets, resident
                pl.BlockSpec((WV, JC), lambda i: (0, 0)),   # folded weights, resident
                pl.BlockSpec((1, C), lambda i: (0, 0)),     # conv bias, resident
            ],
            out_specs=pl.BlockSpec((TB, C), lambda i: (i, 0)),
        ),
        compiler_params=pltpu.CompilerParams(
            # words are fully independent -> shard across v7x's 2 TensorCores
            dimension_semantics=("parallel",)),
    )(ids_flat, expander, vcol, big_kmat, bias2d)

    return out[:N].reshape(B, S, C)


if __name__ == "__main__":
    key = jax.random.PRNGKey(0)
    k1, k2, k3, k4 = jax.random.split(key, 4)

    # Small shapes consistent with the module:
    B, S, W = 2, 8, 16          # batch, seq_len, word_len
    V, D = 64, 8                # len(vocab), char_embedding_size
    C, kw = 32, 5               # char_channel_size, char_channel_width

    # (forward is weight-agnostic; use O(0.1)-scale weights for a sharp check
    # instead of the module's uniform(-0.001, 0.001) init)
    table = jax.random.uniform(k1, (V, D), jnp.float32, -0.1, 0.1)
    conv_w = jax.random.normal(k2, (C, 1, D, kw), jnp.float32) * 0.1
    conv_b = jax.random.normal(k3, (C,), jnp.float32) * 0.1
    ids = jax.random.randint(k4, (B, S, W), 0, V, dtype=jnp.int32)

    @jax.jit
    def run(ids, table, conv_w, conv_b):
        folded = fold_char_embedder_weights(table, conv_w, conv_b,
                                            word_len=ids.shape[-1])
        return char_embedder_forward(ids, *folded)

    out = jax.block_until_ready(run(ids, table, conv_w, conv_b))

    # ---- float64 numpy reference reproducing the PyTorch forward exactly ---
    ids_np = np.asarray(ids)
    tab_np = np.asarray(table, dtype=np.float64)
    w_np = np.asarray(conv_w, dtype=np.float64)
    b_np = np.asarray(conv_b, dtype=np.float64)

    emb = tab_np[ids_np]                                  # embedding gather (B,S,W,D)
    x = emb.reshape(B * S, D, W)                          # torch .view(-1, D, W) reinterpret
    J = W - kw + 1
    conv = np.stack(
        [np.einsum('ndt,cdt->nc', x[:, :, j:j + kw], w_np[:, 0]) for j in range(J)],
        axis=-1) + b_np[None, :, None]                    # (B*S, C, J)
    ref = conv.max(axis=-1).reshape(B, S, C)

    assert out.shape == (B, S, C)
    assert out.dtype == jnp.float32
    err = float(np.max(np.abs(np.asarray(out, dtype=np.float64) - ref)))
    # tolerance leaves headroom for bf16 folded weights + f32 MXU accumulation;
    # real bugs are O(0.1)
    assert np.allclose(np.asarray(out), ref, rtol=2e-2, atol=5e-3), f"max|diff|={err}"
    print("KERNEL_OK")
</pallas_src>

<mosaic_0001>
module attributes {stable_mosaic.version = 11 : i64} {
  func.func @_char_embedder_kernel(%arg0: i32, %arg1: memref<8x16xi32, #tpu.memory_space<vmem>>, %arg2: memref<16x1024xf32, #tpu.memory_space<vmem>>, %arg3: memref<1x1024xf32, #tpu.memory_space<vmem>>, %arg4: memref<1024x384xbf16, #tpu.memory_space<vmem>>, %arg5: memref<1x32xf32, #tpu.memory_space<vmem>>, %arg6: memref<8x32xf32, #tpu.memory_space<vmem>>) attributes {dimension_semantics = [#tpu.dimension_semantics<parallel>], iteration_bounds = array<i64: 2>, scalar_prefetch = 0 : i64, scratch_operands = 0 : i64, tpu.core_type = #tpu.core_type<tc>, window_params = [{transform_indices = @transform_0, window_bounds = array<i64: 8, 16>}, {pipeline_mode = #tpu.pipeline_mode<synchronous>, transform_indices = @transform_1, window_bounds = array<i64: 16, 1024>}, {pipeline_mode = #tpu.pipeline_mode<synchronous>, transform_indices = @transform_2, window_bounds = array<i64: 1, 1024>}, {pipeline_mode = #tpu.pipeline_mode<synchronous>, transform_indices = @transform_3, window_bounds = array<i64: 1024, 384>}, {pipeline_mode = #tpu.pipeline_mode<synchronous>, transform_indices = @transform_4, window_bounds = array<i64: 1, 32>}, {transform_indices = @transform_5, window_bounds = array<i64: 8, 32>}]} {
    %c0 = arith.constant 0 : index
    %c0_0 = arith.constant 0 : index
    %0 = vector.load %arg1[%c0, %c0_0] : memref<8x16xi32, #tpu.memory_space<vmem>>, vector<8x16xi32>
    %1 = arith.sitofp %0 : vector<8x16xi32> to vector<8x16xf32>
    %c0_1 = arith.constant 0 : index
    %c0_2 = arith.constant 0 : index
    %2 = vector.load %arg2[%c0_1, %c0_2] : memref<16x1024xf32, #tpu.memory_space<vmem>>, vector<16x1024xf32>
    %cst = arith.constant dense<0.000000e+00> : vector<8x1024xf32>
    %3 = tpu.matmul %1, %2, %cst {dimension_numbers = #tpu.dot_dimension_numbers<[1], [0], [0], [1], [0, 0, 1, 1], [], []>} : vector<8x16xf32>, vector<16x1024xf32>, vector<8x1024xf32> -> vector<8x1024xf32>
    %c0_3 = arith.constant 0 : index
    %c0_4 = arith.constant 0 : index
    %4 = vector.load %arg3[%c0_3, %c0_4] : memref<1x1024xf32, #tpu.memory_space<vmem>>, vector<1x1024xf32>
    %5 = vector.broadcast %4 : vector<1x1024xf32> to vector<8x1024xf32>
    %6 = arith.cmpf oeq, %3, %5 : vector<8x1024xf32>
    %cst_5 = arith.constant 1.000000e+00 : f32
    %cst_6 = arith.constant 0.000000e+00 : f32
    %7 = vector.broadcast %cst_5 : f32 to vector<8x1024xf32>
    %8 = vector.broadcast %cst_6 : f32 to vector<8x1024xf32>
    %9 = arith.select %6, %7, %8 : vector<8x1024xi1>, vector<8x1024xf32>
    %10 = arith.truncf %9 : vector<8x1024xf32> to vector<8x1024xbf16>
    %c0_7 = arith.constant 0 : index
    %c0_8 = arith.constant 0 : index
    %11 = vector.load %arg4[%c0_7, %c0_8] : memref<1024x384xbf16, #tpu.memory_space<vmem>>, vector<1024x384xbf16>
    %cst_9 = arith.constant dense<0.000000e+00> : vector<8x384xf32>
    %12 = tpu.matmul %10, %11, %cst_9 {dimension_numbers = #tpu.dot_dimension_numbers<[1], [0], [0], [1], [0, 0, 1, 1], [], []>} : vector<8x1024xbf16>, vector<1024x384xbf16>, vector<8x384xf32> -> vector<8x384xf32>
    %13 = vector.extract_strided_slice %12 {offsets = [0, 0], sizes = [8, 32], strides = [1, 1]} : vector<8x384xf32> to vector<8x32xf32>
    %14 = vector.extract_strided_slice %12 {offsets = [0, 32], sizes = [8, 32], strides = [1, 1]} : vector<8x384xf32> to vector<8x32xf32>
    %15 = arith.maximumf %13, %14 : vector<8x32xf32>
    %16 = vector.extract_strided_slice %12 {offsets = [0, 64], sizes = [8, 32], strides = [1, 1]} : vector<8x384xf32> to vector<8x32xf32>
    %17 = arith.maximumf %15, %16 : vector<8x32xf32>
    %18 = vector.extract_strided_slice %12 {offsets = [0, 96], sizes = [8, 32], strides = [1, 1]} : vector<8x384xf32> to vector<8x32xf32>
    %19 = arith.maximumf %17, %18 : vector<8x32xf32>
    %20 = vector.extract_strided_slice %12 {offsets = [0, 128], sizes = [8, 32], strides = [1, 1]} : vector<8x384xf32> to vector<8x32xf32>
    %21 = arith.maximumf %19, %20 : vector<8x32xf32>
    %22 = vector.extract_strided_slice %12 {offsets = [0, 160], sizes = [8, 32], strides = [1, 1]} : vector<8x384xf32> to vector<8x32xf32>
    %23 = arith.maximumf %21, %22 : vector<8x32xf32>
    %24 = vector.extract_strided_slice %12 {offsets = [0, 192], sizes = [8, 32], strides = [1, 1]} : vector<8x384xf32> to vector<8x32xf32>
    %25 = arith.maximumf %23, %24 : vector<8x32xf32>
    %26 = vector.extract_strided_slice %12 {offsets = [0, 224], sizes = [8, 32], strides = [1, 1]} : vector<8x384xf32> to vector<8x32xf32>
    %27 = arith.maximumf %25, %26 : vector<8x32xf32>
    %28 = vector.extract_strided_slice %12 {offsets = [0, 256], sizes = [8, 32], strides = [1, 1]} : vector<8x384xf32> to vector<8x32xf32>
    %29 = arith.maximumf %27, %28 : vector<8x32xf32>
    %30 = vector.extract_strided_slice %12 {offsets = [0, 288], sizes = [8, 32], strides = [1, 1]} : vector<8x384xf32> to vector<8x32xf32>
    %31 = arith.maximumf %29, %30 : vector<8x32xf32>
    %32 = vector.extract_strided_slice %12 {offsets = [0, 320], sizes = [8, 32], strides = [1, 1]} : vector<8x384xf32> to vector<8x32xf32>
    %33 = arith.maximumf %31, %32 : vector<8x32xf32>
    %34 = vector.extract_strided_slice %12 {offsets = [0, 352], sizes = [8, 32], strides = [1, 1]} : vector<8x384xf32> to vector<8x32xf32>
    %35 = arith.maximumf %33, %34 : vector<8x32xf32>
    %c0_10 = arith.constant 0 : index
    %c0_11 = arith.constant 0 : index
    %36 = vector.load %arg5[%c0_10, %c0_11] : memref<1x32xf32, #tpu.memory_space<vmem>>, vector<1x32xf32>
    %37 = vector.broadcast %36 : vector<1x32xf32> to vector<8x32xf32>
    %38 = arith.addf %35, %37 : vector<8x32xf32>
    %c0_12 = arith.constant 0 : index
    %c0_13 = arith.constant 0 : index
    %39 = vector.load %arg6[%c0_12, %c0_13] : memref<8x32xf32, #tpu.memory_space<vmem>>, vector<8x32xf32>
    tpu.vector_store %arg6[%c0_12, %c0_13], %38 {strides = array<i32>} : memref<8x32xf32, #tpu.memory_space<vmem>>, vector<8x32xf32>,
    return
  }
  func.func @transform_0(%arg0: i32) -> (i32, i32) {
    %c0_i32 = arith.constant 0 : i32
    %c0_i32_0 = arith.constant 0 : i32
    return %arg0, %c0_i32 : i32, i32
  }
  func.func @transform_1(%arg0: i32) -> (i32, i32) {
    %c0_i32 = arith.constant 0 : i32
    %c0_i32_0 = arith.constant 0 : i32
    %c0_i32_1 = arith.constant 0 : i32
    return %c0_i32, %c0_i32_0 : i32, i32
  }
  func.func @transform_2(%arg0: i32) -> (i32, i32) {
    %c0_i32 = arith.constant 0 : i32
    %c0_i32_0 = arith.constant 0 : i32
    %c0_i32_1 = arith.constant 0 : i32
    return %c0_i32, %c0_i32_0 : i32, i32
  }
  func.func @transform_3(%arg0: i32) -> (i32, i32) {
    %c0_i32 = arith.constant 0 : i32
    %c0_i32_0 = arith.constant 0 : i32
    %c0_i32_1 = arith.constant 0 : i32
    return %c0_i32, %c0_i32_0 : i32, i32
  }
  func.func @transform_4(%arg0: i32) -> (i32, i32) {
    %c0_i32 = arith.constant 0 : i32
    %c0_i32_0 = arith.constant 0 : i32
    %c0_i32_1 = arith.constant 0 : i32
    return %c0_i32, %c0_i32_0 : i32, i32
  }
  func.func @transform_5(%arg0: i32) -> (i32, i32) {
    %c0_i32 = arith.constant 0 : i32
    %c0_i32_0 = arith.constant 0 : i32
    return %arg0, %c0_i32 : i32, i32
  }
}

</mosaic_0001>

<bundles_post_ra>
// kernel: run.1
= control target key start
LH: loop header
LB: loop body
LE: loop exit
PB: predicated region body
PF: predicated region fallthrough
CT: control target
= control target key end

     0   :  { %10 = vsyncpa [#allocation3], 0  ;;  %s3879_s0 = inlined_call_operand.vmem [shape: s32[16,16], index: 0, kind: input, shape index: {}]   ;;  %s3880_s1 = inlined_call_operand.vmem [shape: f32[16,1024], index: 1, kind: input, shape index: {}]   ;;  %s3881_s2 = inlined_call_operand.vmem [shape: f32[1,1024], index: 2, kind: input, shape index: {}]   ;;  %s3882_s3 = inlined_call_operand.vmem [shape: bf16[1024,384], index: 3, kind: input, shape index: {}]   ;;  %s3883_s4 = inlined_call_operand.vmem [shape: f32[1,32], index: 4, kind: input, shape index: {}]   ;;  %s3884_s5 = inlined_call_operand.hbm [shape: f32[16,32], index: 5, kind: output, shape index: {}]  }
   0x1   :  { %12 = vsyncpa [#allocation3 + $0x1], 0  ;;  %s3046_s18 = smov 0   ;;  %s3048_s19 = smov 0  }
   0x2   :  { %s3050_s20 = smov 0   ;;  %s3052_s21 = smov 0  }
   0x3 LB: > { %s3067_s22 = sadd.s32 4294967295, %s3008_s21   ;;  %s2321_s23 = sadd.s32 4294967294, %s3008_s21   ;;  %s3008_s21 = sphi %s3052_s21, %s3906_s21   ;;  %s3004_s20 = sphi %s3050_s20, %s3905_s20   ;;  %s3000_s19 = sphi %s3048_s19, %s3904_s19   ;;  %s2996_s18 = sphi %s3046_s18, %s3903_s18  }
   0x4   : > { %s3071_s24 = sadd.s32 1, %s3008_s21   ;;  %s135_s25 = sadd.s32 1, %s3004_s20 }
   0x5   : > { %s132_s26 = ssub.s32 %s3008_s21, %s3071_s24  ;;  %p145_p0 = scmp.ne.s32.totalorder %s3004_s20, %s3000_s19 }
   0x6   : > { %p133_p1 = scmp.eq.s32.totalorder %s132_s26, 0  ;;  %p146_p2 = scmp.eq.s32.totalorder %s3067_s22, 1 }
   0x7   : > { %p151_p3 = scmp.ne.s32.totalorder %s3000_s19, %s2996_s18  ;;  %p152_p4 = scmp.eq.s32.totalorder %s2321_s23, 1 }
   0x8   : > { %s3082_s27 = scalar_select %p133_p1, %s3004_s20, %s135_s25  }
   0x9   : > { %p3084_p5 = por %p146_p2, %p145_p0  ;;  %p3088_p6 = por %p152_p4, %p151_p3 }
   0xa   : > { %p2324_p7 = scmp.ge.s32.totalorder %s3008_s21, 1  ;;  %p189_p8 = scmp.lt.s32.totalorder %s3008_s21, 3 }
   0xc   : > { %p190_p9 = pnand %p2324_p7, %p189_p8 }
   0xd   : > { %p216_p10 = scmp.lt.s32.totalorder (!%p190_p9), %s3067_s22, 1  ;;  %s3012_s12 = smov (!%p190_p9), 32  }
   0xe   : > { %193 = sbr.rel (%p190_p9) target bundleno = 689 (0x2b1), region = 40  ;;  %s3014_s14 = smov (!%p190_p9), 64  }
   0xf   : > { %s213_s15 = sand.u32 (!%p190_p9), 1, %s3000_s19   ;;  %s2557_s25 = sshll.u32 (!%p190_p9), %s3067_s22, 7 }
  0x10   : > { %s2325_s16 = sshll.u32 (!%p190_p9), %s213_s15, 3  ;;  %s2260_s8 = scalar_lea.hbm (!%p190_p9), %s3884_s5, %s2557_s25 }
  0x11   : > { %s215_s26 = scalar_lea.vmem (!%p190_p9), [#allocation2], %s2325_s16  ;;  %s2249_s9 = scalar_lea.sflag (!%p190_p9), [#allocation3], %s213_s15 }
  0x12   : > { %s3015_s11 = smov (!%p190_p9), [#allocation2]  }
  0x13   : > { %v232_v0 = vld [vmem:[%s3880_s1 + $0x48] sm:$0xff]  ;;  %v234_v1 = vld [vmem:[%s3880_s1 + $0x58] sm:$0xff]  ;;  %v231_v2 = vld [vmem:[%s3880_s1 + $0x40] sm:$0xff]  ;;  %s217_s30 = scalar_select %p216_p10, %s3067_s22, 1  ;;  %v3010_v10 = vmov 0.0   ;;  %vm239_vm0 = vcmask 130048  }
  0x14   : > { %271 = vmatprep.subr.mxu0 %v232_v0  ;;  %342 = vmatprep.subr.mxu1 %v234_v1  ;;  %v233_v3 = vld [vmem:[%s3880_s1 + $0x50] sm:$0xff]  ;;  %v224_v4 = vld [vmem:[%s3880_s1 + $0x8] sm:$0xff]  ;;  %v226_v5 = vld [vmem:[%s3880_s1 + $0x18] sm:$0xff] }
  0x15   : > { %272 = vmatpush1.msra.mxu0 %v231_v2  ;;  %343 = vmatpush1.msra.mxu1 %v233_v3  ;;  %v223_v6 = vld [vmem:[%s3880_s1] sm:$0xff]  ;;  %v225_v7 = vld [vmem:[%s3880_s1 + $0x10] sm:$0xff]  ;;  %v236_v8 = vld [vmem:[%s3880_s1 + $0x68] sm:$0xff]  ;;  %s2326_s10 = sshll.u32 %s217_s30, 3  ;;  %s2262_s30 = sshll.u32 %s215_s26, 4  ;;  %s2263_s30 = int_to_ptr.vmem [resolvable:$true] %s2262_s30 }
  0x16   : > { %273 = vmatprep.subr.mxu0 %v224_v4  ;;  %344 = vmatprep.subr.mxu1 %v226_v5  ;;  %v238_v9 = vld [vmem:[%s3880_s1 + $0x78] sm:$0xff]  ;;  %s219_s13 = scalar_lea.vmem %s3879_s0, %s2326_s10  ;;  %v235_v12 = vld [vmem:[%s3880_s1 + $0x60] sm:$0xff]  ;;  %v228_v13 = vld [vmem:[%s3880_s1 + $0x28] sm:$0xff]  ;;  %s2948_s10 = scalar_lea.vmem %s2263_s30, 128 }
  0x17   : > { %274 = vmatpush1.msra.mxu0 %v223_v6  ;;  %307 = vmatprep.mubr.f32.mxu0 %v3010_v10  ;;  %v221_v11 = vld [vmem:[%s219_s13] sm:$0xff]  ;;  %v237_v15 = vld [vmem:[%s3880_s1 + $0x70] sm:$0xff]  ;;  %v230_v17 = vld [vmem:[%s3880_s1 + $0x38] sm:$0xff]  ;;  %s3013_s13 = smov 96   ;;  %p2949_p11 = scmp.ne.s32.totalorder %s2263_s30, %s2948_s10 }
  0x18   : > { %345 = vmatpush1.msra.mxu1 %v225_v7  ;;  %378 = vmatprep.mubr.f32.mxu1 %v3010_v10  ;;  %v222_v14 = vcvt.s32.f32 %v221_v11  ;;  %v227_v16 = vld [vmem:[%s3880_s1 + $0x20] sm:$0xff]  ;;  %v229_v18 = vld [vmem:[%s3880_s1 + $0x30] sm:$0xff]  ;;  %v2694_v20 = vld [vmem:[%s3882_s3 + $0xac] ss:$12 sps:$4 sm:$0xff]  }
  0x19   : > { %413 = vmatprep.subr.mxu0 %v236_v8  ;;  %484 = vmatprep.subr.mxu1 %v238_v9  ;;  %v2692_v19 = vld [vmem:[%s3882_s3 + $0xa8] ss:$12 sps:$4 sm:$0xff]   ;;  %v2697_v21 = vld [vmem:[%s3882_s3 + $0x22c] ss:$12 sps:$4 sm:$0xff]   ;;  %v2698_v25 = vld [vmem:[%s3882_s3 + $0x90] ss:$12 sps:$4 sm:$0xff]   ;;  %p2950_p12 = pnand %p2949_p11, %p3084_p5 }
  0x1a   : > { %2327 = vmatmul.mubr.msk.f32.vlgmr.msra.gmra.mxu0 %vm239_vm0, %v222_v14  ;;  %2328 = vmatmul.mubr.msk.f32.vlgmr.msra.gmra.mxu1 %vm239_vm0, %v222_v14  ;;  %v2695_v22 = vld [vmem:[%s3882_s3 + $0x228] ss:$12 sps:$4 sm:$0xff]   ;;  %v2701_v26 = vld [vmem:[%s3882_s3 + $0x210] ss:$12 sps:$4 sm:$0xff]   ;;  %v2704_v29 = vld [vmem:[%s3882_s3 + $0x78] ss:$12 sps:$4 sm:$0xff]  }
  0x1b   : > { %414 = vmatpush1.msra.mxu0 %v235_v12  ;;  %485 = vmatpush1.msra.mxu1 %v237_v15  ;;  %v2700_v23 = vld [vmem:[%s3882_s3 + $0x94] ss:$12 sps:$4 sm:$0xff]   ;;  %v2706_v27 = vld [vmem:[%s3882_s3 + $0x7c] ss:$12 sps:$4 sm:$0xff]   ;;  %v2707_v30 = vld [vmem:[%s3882_s3 + $0x1f8] ss:$12 sps:$4 sm:$0xff]   ;;  %p2951_p13 = pneg %p2950_p12 }
  0x1c   : > { %415 = vmatprep.subr.mxu0 %v228_v13  ;;  %449 = vmatprep.mubr.f32.mxu0 %v3010_v10  ;;  %v2703_v24 = vld [vmem:[%s3882_s3 + $0x214] ss:$12 sps:$4 sm:$0xff]   ;;  %v2709_v28 = vld [vmem:[%s3882_s3 + $0x1fc] ss:$12 sps:$4 sm:$0xff]   ;;  %v2712_v31 = vld [vmem:[%s3882_s3 + $0x64] ss:$12 sps:$4 sm:$0xff]  }
  0x1d   : > { %416 = vmatpush1.msra.mxu0 %v227_v16  ;;  %486 = vmatprep.subr.mxu1 %v230_v17  ;;  %v2715_v32 = vld [vmem:[%s3882_s3 + $0x1e4] ss:$12 sps:$4 sm:$0xff]   ;;  %v2710_v33 = vld [vmem:[%s3882_s3 + $0x60] ss:$12 sps:$4 sm:$0xff]   ;;  %v2716_v37 = vld [vmem:[%s3882_s3 + $0x48] ss:$12 sps:$4 sm:$0xff]  }
  0x1e   : > { %2329 = vmatmul.mubr.msk.f32.vlgmr.msra.gmra.mxu0 %vm239_vm0, %v222_v14  ;;  %487 = vmatpush1.msra.mxu1 %v229_v18  ;;  %v2713_v34 = vld [vmem:[%s3882_s3 + $0x1e0] ss:$12 sps:$4 sm:$0xff]   ;;  %v2719_v38 = vld [vmem:[%s3882_s3 + $0x1c8] ss:$12 sps:$4 sm:$0xff]   ;;  %v2722_v41 = vld [vmem:[%s3882_s3 + $0x30] ss:$12 sps:$4 sm:$0xff]  }
  0x1f   : > { %520 = vmatprep.mubr.f32.mxu1 %v3010_v10  ;;  %1873 = vmatprep.subr.bf16.mxu0 %v2694_v20  ;;  %v2718_v35 = vld [vmem:[%s3882_s3 + $0x4c] ss:$12 sps:$4 sm:$0xff]   ;;  %v2724_v39 = vld [vmem:[%s3882_s3 + $0x34] ss:$12 sps:$4 sm:$0xff]   ;;  %v2725_v42 = vld [vmem:[%s3882_s3 + $0x1b0] ss:$12 sps:$4 sm:$0xff]  }
  0x20   : > { %2330 = vmatmul.mubr.msk.f32.vlgmr.msra.gmra.mxu1 %vm239_vm0, %v222_v14  ;;  %1914 = vmatprep.subr.bf16.mxu1 %v2697_v21  ;;  %v2721_v36 = vld [vmem:[%s3882_s3 + $0x1cc] ss:$12 sps:$4 sm:$0xff]   ;;  %v2727_v40 = vld [vmem:[%s3882_s3 + $0x1b4] ss:$12 sps:$4 sm:$0xff]   ;;  %v2730_v43 = vld [vmem:[%s3882_s3 + $0x1c] ss:$12 sps:$4 sm:$0xff]   ;;  %v529_v21 = vlaneseq }
  0x21   : > { %1874 = vmatpush1.bf16.msra.mxu0 %v2692_v19  ;;  %1915 = vmatpush1.bf16.msra.mxu1 %v2695_v22  ;;  %v2733_v44 = vld [vmem:[%s3882_s3 + $0x19c] ss:$12 sps:$4 sm:$0xff]   ;;  %v2728_v45 = vld [vmem:[%s3882_s3 + $0x18] ss:$12 sps:$4 sm:$0xff]   ;;  %v2734_v49 = vld [vmem:[%s3882_s3] ss:$12 sps:$4 sm:$0xff]  }
  0x22   : > { %1875 = vmatprep.subr.bf16.mxu0 %v2700_v23  ;;  %1916 = vmatprep.subr.bf16.mxu1 %v2703_v24  ;;  %v2731_v46 = vld [vmem:[%s3882_s3 + $0x198] ss:$12 sps:$4 sm:$0xff]   ;;  %v2737_v50 = vld [vmem:[%s3882_s3 + $0x180] ss:$12 sps:$4 sm:$0xff]   ;;  %v2740_v53 = vld [vmem:[%s3882_s3 + $0x168] ss:$12 sps:$4 sm:$0xff]  }
  0x23   : > { %v2736_v47 = vld [vmem:[%s3882_s3 + $0x4] ss:$12 sps:$4 sm:$0xff]   ;;  %v2742_v51 = vld [vmem:[%s3882_s3 + $0x16c] ss:$12 sps:$4 sm:$0xff]   ;;  %v2743_v54 = vld [vmem:[%s3882_s3 + $0x2e8] ss:$12 sps:$4 sm:$0xff]  }
  0x24   : > { %v2739_v48 = vld [vmem:[%s3882_s3 + $0x184] ss:$12 sps:$4 sm:$0xff]   ;;  %v2745_v52 = vld [vmem:[%s3882_s3 + $0x2ec] ss:$12 sps:$4 sm:$0xff]   ;;  %v2748_v55 = vld [vmem:[%s3882_s3 + $0x154] ss:$12 sps:$4 sm:$0xff]  }
  0x25   : > { %1876 = vmatpush1.bf16.msra.mxu0 %v2698_v25  ;;  %1917 = vmatpush1.bf16.msra.mxu1 %v2701_v26  ;;  %v2751_v56 = vld [vmem:[%s3882_s3 + $0x2d4] ss:$12 sps:$4 sm:$0xff]   ;;  %v2746_v57 = vld [vmem:[%s3882_s3 + $0x150] ss:$12 sps:$4 sm:$0xff]   ;;  %v2752_v61 = vld [vmem:[%s3882_s3 + $0x138] ss:$12 sps:$4 sm:$0xff]  }
  0x26   : > { %1877 = vmatprep.subr.bf16.mxu0 %v2706_v27  ;;  %1918 = vmatprep.subr.bf16.mxu1 %v2709_v28  ;;  %v2749_v58 = vld [vmem:[%s3882_s3 + $0x2d0] ss:$12 sps:$4 sm:$0xff]   ;;  %v2755_v62 = vld [vmem:[%s3882_s3 + $0x2b8] ss:$12 sps:$4 sm:$0xff]   ;;  %v2758_v1 = vld [vmem:[%s3882_s3 + $0x120] ss:$12 sps:$4 sm:$0xff]  }
  0x27   : > { %v2754_v59 = vld [vmem:[%s3882_s3 + $0x13c] ss:$12 sps:$4 sm:$0xff]   ;;  %v2760_v63 = vld [vmem:[%s3882_s3 + $0x124] ss:$12 sps:$4 sm:$0xff]   ;;  %v2761_v2 = vld [vmem:[%s3882_s3 + $0x2a0] ss:$12 sps:$4 sm:$0xff]  }
  0x28   : > { %v2757_v60 = vld [vmem:[%s3882_s3 + $0x2bc] ss:$12 sps:$4 sm:$0xff]   ;;  %v2763_v0 = vld [vmem:[%s3882_s3 + $0x2a4] ss:$12 sps:$4 sm:$0xff]   ;;  %v2766_v3 = vld [vmem:[%s3882_s3 + $0x10c] ss:$12 sps:$4 sm:$0xff]  }
  0x29   : > { %1878 = vmatpush1.bf16.msra.mxu0 %v2704_v29  ;;  %1919 = vmatpush1.bf16.msra.mxu1 %v2707_v30  ;;  %v2769_v4 = vld [vmem:[%s3882_s3 + $0x28c] ss:$12 sps:$4 sm:$0xff]   ;;  %v2764_v5 = vld [vmem:[%s3882_s3 + $0x108] ss:$12 sps:$4 sm:$0xff]   ;;  %v2770_v9 = vld [vmem:[%s3882_s3 + $0xf0] ss:$12 sps:$4 sm:$0xff]  }
  0x2a   : > { %1879 = vmatprep.subr.bf16.mxu0 %v2712_v31  ;;  %1920 = vmatprep.subr.bf16.mxu1 %v2715_v32  ;;  %v2767_v6 = vld [vmem:[%s3882_s3 + $0x288] ss:$12 sps:$4 sm:$0xff]   ;;  %v2773_v10 = vld [vmem:[%s3882_s3 + $0x270] ss:$12 sps:$4 sm:$0xff]   ;;  %v2776_v13 = vld [vmem:[%s3882_s3 + $0xd8] ss:$12 sps:$4 sm:$0xff]  }
  0x2b   : > { %v2772_v7 = vld [vmem:[%s3882_s3 + $0xf4] ss:$12 sps:$4 sm:$0xff]   ;;  %v2778_v11 = vld [vmem:[%s3882_s3 + $0xdc] ss:$12 sps:$4 sm:$0xff]   ;;  %v2779_v14 = vld [vmem:[%s3882_s3 + $0x258] ss:$12 sps:$4 sm:$0xff]  }
  0x2c   : > { %v2775_v8 = vld [vmem:[%s3882_s3 + $0x274] ss:$12 sps:$4 sm:$0xff]   ;;  %v2781_v12 = vld [vmem:[%s3882_s3 + $0x25c] ss:$12 sps:$4 sm:$0xff]   ;;  %v2784_v15 = vld [vmem:[%s3882_s3 + $0xc4] ss:$12 sps:$4 sm:$0xff]  }
  0x2d   : > { %1880 = vmatpush1.bf16.msra.mxu0 %v2710_v33  ;;  %1921 = vmatpush1.bf16.msra.mxu1 %v2713_v34  ;;  %v2787_v16 = vld [vmem:[%s3882_s3 + $0x244] ss:$12 sps:$4 sm:$0xff]   ;;  %v2782_v17 = vld [vmem:[%s3882_s3 + $0xc0] ss:$12 sps:$4 sm:$0xff]   ;;  %v3349_v22 = vshrl.u32 %v529_v21, 7 }
  0x2e   : > { %1881 = vmatprep.subr.bf16.mxu0 %v2718_v35  ;;  %1922 = vmatprep.subr.bf16.mxu1 %v2721_v36  ;;  %v2785_v18 = vld [vmem:[%s3882_s3 + $0x240] ss:$12 sps:$4 sm:$0xff]   ;;  %v2923_v36 = vld [vmem:[%s3882_s3 + $0x518] ss:$12 sps:$4 sm:$0xff]  }
  0x2f   : > { %v2790_v19 = vld [vmem:[%s3882_s3 + $0x3ac] ss:$12 sps:$4 sm:$0xff]   ;;  %v531_v23 = vsub.s32 0, %v3349_v22  ;;  %v539_v24 = vsub.s32 2, %v3349_v22  ;;  %v3356_v25 = vld [vmem:[%s3881_s2] sm:$0xff]  ;;  %v535_v26 = vsub.s32 1, %v3349_v22 }
  0x30   : > { %v2793_v20 = vld [vmem:[%s3882_s3 + $0x52c] ss:$12 sps:$4 sm:$0xff]   ;;  %v543_v27 = vsub.s32 3, %v3349_v22  ;;  %v551_v32 = vsub.s32 5, %v3349_v22  ;;  %v559_v35 = vsub.s32 7, %v3349_v22 }
  0x31   : > { %1882 = vmatpush1.bf16.msra.mxu0 %v2716_v37  ;;  %1923 = vmatpush1.bf16.msra.mxu1 %v2719_v38  ;;  %v532_v28 = vrot.slane %v3356_v25, %v531_v23  ;;  %v540_v29 = vrot.slane %v3356_v25, %v539_v24  ;;  %v536_v30 = vrot.slane %v3356_v25, %v535_v26  ;;  %v2844_v21 = vld [vmem:[%s3882_s3 + $0x454] ss:$12 sps:$4 sm:$0xff]   ;;  %v2842_v24 = vld [vmem:[%s3882_s3 + $0x450] ss:$12 sps:$4 sm:$0xff]  }
  0x32   : > { %1883 = vmatprep.subr.bf16.mxu0 %v2724_v39  ;;  %1924 = vmatprep.subr.bf16.mxu1 %v2727_v40  ;;  %v544_v31 = vrot.slane %v3356_v25, %v543_v27  ;;  %v2788_v40 = vld [vmem:[%s3882_s3 + $0x3a8] ss:$12 sps:$4 sm:$0xff]   ;;  %v2845_v26 = vld [vmem:[%s3882_s3 + $0x5d0] ss:$12 sps:$4 sm:$0xff]   ;;  %v2925_v39 = vld [vmem:[%s3882_s3 + $0x5c0] ss:$12 sps:$4 sm:$0xff]  }
  0x33   : > { %v2847_v23 = vld [vmem:[%s3882_s3 + $0x5d4] ss:$12 sps:$4 sm:$0xff]   ;;  %v2850_v27 = vld [vmem:[%s3882_s3 + $0x43c] ss:$12 sps:$4 sm:$0xff]  }
  0x35   : > { %1884 = vmatpush1.bf16.msra.mxu0 %v2722_v41  ;;  %1925 = vmatpush1.bf16.msra.mxu1 %v2725_v42  ;;  %v552_v41 = vrot.slane %v3356_v25, %v551_v32  ;;  %v2859_v32 = vld [vmem:[%s3882_s3 + $0x5a4] ss:$12 sps:$4 sm:$0xff]   ;;  %v2894_v42 = vld [vmem:[%s3882_s3 + $0x80] ss:$12 sps:$4 sm:$0xff]  }
  0x36   : > { %1885 = vmatprep.subr.bf16.mxu0 %v2730_v43  ;;  %1926 = vmatprep.subr.bf16.mxu1 %v2733_v44  ;;  %v2791_v43 = vld [vmem:[%s3882_s3 + $0x528] ss:$12 sps:$4 sm:$0xff]  }
  0x37   : > { %v2796_v44 = vld [vmem:[%s3882_s3 + $0x394] ss:$12 sps:$4 sm:$0xff]  }
  0x39   : > { %1886 = vmatpush1.bf16.msra.mxu0 %v2728_v45  ;;  %1927 = vmatpush1.bf16.msra.mxu1 %v2731_v46  ;;  %v2896_v46 = vld [vmem:[%s3882_s3 + $0x128] ss:$12 sps:$4 sm:$0xff]  }
  0x3a   : > { %1887 = vmatprep.subr.bf16.mxu0 %v2736_v47  ;;  %1928 = vmatprep.subr.bf16.mxu1 %v2739_v48  ;;  %v3011_v47 = vmov 1.0|1.0   ;;  %v2799_v48 = vld [vmem:[%s3882_s3 + $0x514] ss:$12 sps:$4 sm:$0xff]  }
  0x3d   : > { %1888 = vmatpush1.bf16.msra.mxu0 %v2734_v49  ;;  %1929 = vmatpush1.bf16.msra.mxu1 %v2737_v50  ;;  %v560_v49 = vrot.slane %v3356_v25, %v559_v35  ;;  %v2862_v35 = vld [vmem:[%s3882_s3 + $0x40c] ss:$12 sps:$4 sm:$0xff]  }
  0x3e   : > { %1889 = vmatprep.subr.bf16.mxu0 %v2742_v51  ;;  %1930 = vmatprep.subr.bf16.mxu1 %v2745_v52  ;;  %v2794_v52 = vld [vmem:[%s3882_s3 + $0x390] ss:$12 sps:$4 sm:$0xff]  }
  0x41   : > { %1890 = vmatpush2.bf16.msra.mxu0 %v2740_v53  ;;  %1931 = vmatpush2.bf16.msra.mxu1 %v2743_v54  ;;  %v2797_v53 = vld [vmem:[%s3882_s3 + $0x510] ss:$12 sps:$4 sm:$0xff]  }
  0x42   : > { %1891 = vmatprep.subr.bf16.mxu0 %v2748_v55  ;;  %1932 = vmatprep.subr.bf16.mxu1 %v2751_v56  ;;  %v2802_v54 = vld [vmem:[%s3882_s3 + $0x37c] ss:$12 sps:$4 sm:$0xff]  }
  0x43   : > { %v2805_v56 = vld [vmem:[%s3882_s3 + $0x4fc] ss:$12 sps:$4 sm:$0xff]  }
  0x45   : > { %1892 = vmatpush2.bf16.msra.mxu0 %v2746_v57  ;;  %1933 = vmatpush2.bf16.msra.mxu1 %v2749_v58  ;;  %v2926_v57 = vld [vmem:[%s3882_s3 + $0x380] ss:$12 sps:$4 sm:$0xff]   ;;  %v2928_v58 = vld [vmem:[%s3882_s3 + $0x428] ss:$12 sps:$4 sm:$0xff]  }
  0x46   : > { %1893 = vmatprep.subr.bf16.mxu0 %v2754_v59  ;;  %1934 = vmatprep.subr.bf16.mxu1 %v2757_v60  ;;  %v2800_v59 = vld [vmem:[%s3882_s3 + $0x378] ss:$12 sps:$4 sm:$0xff]  }
  0x47   : > { %v2803_v60 = vld [vmem:[%s3882_s3 + $0x4f8] ss:$12 sps:$4 sm:$0xff]  }
  0x49   : > { %1894 = vmatpush2.bf16.msra.mxu0 %v2752_v61  ;;  %1935 = vmatpush2.bf16.msra.mxu1 %v2755_v62  ;;  %v2808_v61 = vld [vmem:[%s3882_s3 + $0x364] ss:$12 sps:$4 sm:$0xff]  }
  0x4a   : > { %1895 = vmatprep.subr.bf16.mxu0 %v2760_v63  ;;  %1936 = vmatprep.subr.bf16.mxu1 %v2763_v0  ;;  %v2811_v62 = vld [vmem:[%s3882_s3 + $0x4e4] ss:$12 sps:$4 sm:$0xff]   ;;  %v2806_v63 = vld [vmem:[%s3882_s3 + $0x360] ss:$12 sps:$4 sm:$0xff]  }
  0x4b   : > { %v2809_v0 = vld [vmem:[%s3882_s3 + $0x4e0] ss:$12 sps:$4 sm:$0xff]  }
  0x4d   : > { %1896 = vmatpush2.bf16.msra.mxu0 %v2758_v1  ;;  %1937 = vmatpush2.bf16.msra.mxu1 %v2761_v2  ;;  %v2814_v1 = vld [vmem:[%s3882_s3 + $0x34c] ss:$12 sps:$4 sm:$0xff]  }
  0x4e   : > { %1897 = vmatprep.subr.bf16.mxu0 %v2766_v3  ;;  %1938 = vmatprep.subr.bf16.mxu1 %v2769_v4  ;;  %v2817_v2 = vld [vmem:[%s3882_s3 + $0x4cc] ss:$12 sps:$4 sm:$0xff]   ;;  %v2812_v3 = vld [vmem:[%s3882_s3 + $0x348] ss:$12 sps:$4 sm:$0xff]  }
  0x4f   : > { %v2815_v4 = vld [vmem:[%s3882_s3 + $0x4c8] ss:$12 sps:$4 sm:$0xff]  }
  0x51   : > { %1898 = vmatpush2.bf16.msra.mxu0 %v2764_v5  ;;  %1939 = vmatpush2.bf16.msra.mxu1 %v2767_v6  ;;  %v2820_v5 = vld [vmem:[%s3882_s3 + $0x334] ss:$12 sps:$4 sm:$0xff]  }
  0x52   : > { %1899 = vmatprep.subr.bf16.mxu0 %v2772_v7  ;;  %1940 = vmatprep.subr.bf16.mxu1 %v2775_v8  ;;  %v2823_v6 = vld [vmem:[%s3882_s3 + $0x4b4] ss:$12 sps:$4 sm:$0xff]   ;;  %v2818_v7 = vld [vmem:[%s3882_s3 + $0x330] ss:$12 sps:$4 sm:$0xff]  }
  0x53   : > { %v2821_v8 = vld [vmem:[%s3882_s3 + $0x4b0] ss:$12 sps:$4 sm:$0xff]  }
  0x55   : > { %1900 = vmatpush2.bf16.msra.mxu0 %v2770_v9  ;;  %1941 = vmatpush2.bf16.msra.mxu1 %v2773_v10  ;;  %v2826_v9 = vld [vmem:[%s3882_s3 + $0x31c] ss:$12 sps:$4 sm:$0xff]  }
  0x56   : > { %1901 = vmatprep.subr.bf16.mxu0 %v2778_v11  ;;  %1942 = vmatprep.subr.bf16.mxu1 %v2781_v12  ;;  %v2829_v10 = vld [vmem:[%s3882_s3 + $0x49c] ss:$12 sps:$4 sm:$0xff]   ;;  %v2824_v11 = vld [vmem:[%s3882_s3 + $0x318] ss:$12 sps:$4 sm:$0xff]  }
  0x57   : > { %v2827_v12 = vld [vmem:[%s3882_s3 + $0x498] ss:$12 sps:$4 sm:$0xff]  }
  0x59   : > { %1902 = vmatpush2.bf16.msra.mxu0 %v2776_v13  ;;  %1943 = vmatpush2.bf16.msra.mxu1 %v2779_v14  ;;  %v2832_v13 = vld [vmem:[%s3882_s3 + $0x304] ss:$12 sps:$4 sm:$0xff]  }
  0x5a   : > { %1903 = vmatprep.subr.bf16.mxu0 %v2784_v15  ;;  %1944 = vmatprep.subr.bf16.mxu1 %v2787_v16  ;;  %v2835_v14 = vld [vmem:[%s3882_s3 + $0x484] ss:$12 sps:$4 sm:$0xff]   ;;  %v2830_v15 = vld [vmem:[%s3882_s3 + $0x300] ss:$12 sps:$4 sm:$0xff]  }
  0x5b   : > { %v2833_v16 = vld [vmem:[%s3882_s3 + $0x480] ss:$12 sps:$4 sm:$0xff]  }
  0x5d   : > { %1904 = vmatpush2.bf16.msra.mxu0 %v2782_v17  ;;  %1945 = vmatpush2.bf16.msra.mxu1 %v2785_v18  ;;  %v2838_v17 = vld [vmem:[%s3882_s3 + $0x46c] ss:$12 sps:$4 sm:$0xff]  }
  0x5e   : > { %1955 = vmatprep.subr.bf16.mxu0 %v2790_v19  ;;  %1996 = vmatprep.subr.bf16.mxu1 %v2793_v20  ;;  %v2841_v18 = vld [vmem:[%s3882_s3 + $0x5ec] ss:$12 sps:$4 sm:$0xff]   ;;  %v2836_v19 = vld [vmem:[%s3882_s3 + $0x468] ss:$12 sps:$4 sm:$0xff]  }
  0x5f   : > { %v2839_v20 = vld [vmem:[%s3882_s3 + $0x5e8] ss:$12 sps:$4 sm:$0xff]  }
  0xda   : > { %v309_v33 = vpop.f32.mrf.mxu0  ;;  %v380_v34 = vpop.f32.mrf.mxu1 }
  0xdb   : > { %vm569_vm1 = vcmp.eq.f32.partialorder %v309_v33, %v532_v28  ;;  %vm571_vm2 = vcmp.eq.f32.partialorder %v380_v34, %v540_v29  ;;  %v2853_v28 = vld [vmem:[%s3882_s3 + $0x5bc] ss:$12 sps:$4 sm:$0xff]   ;;  %v2848_v29 = vld [vmem:[%s3882_s3 + $0x438] ss:$12 sps:$4 sm:$0xff]   ;;  %v2854_v33 = vld [vmem:[%s3882_s3 + $0x420] ss:$12 sps:$4 sm:$0xff]  }
  0xdc   : > { %vm3366_vm3 = vmpackc.low %vm569_vm1, %vm569_vm1  ;;  %v311_v37 = vpop.f32.mrf.mxu0  ;;  %v382_v38 = vpop.f32.mrf.mxu1  ;;  %v2857_v34 = vld [vmem:[%s3882_s3 + $0x5a0] ss:$12 sps:$4 sm:$0xff]   ;;  %vm2246_vm1 = vcmask 261120  }
  0xdd   : > { %vm3370_vm4 = vmpackc.low %vm571_vm2, %vm571_vm2  ;;  %vm570_vm5 = vcmp.eq.f32.partialorder %v311_v37, %v536_v30  ;;  %vm572_vm6 = vcmp.eq.f32.partialorder %v382_v38, %v544_v31  ;;  %v2851_v30 = vld [vmem:[%s3882_s3 + $0x5b8] ss:$12 sps:$4 sm:$0xff]   ;;  %v2860_v38 = vld [vmem:[%s3882_s3 + $0x408] ss:$12 sps:$4 sm:$0xff]  }
  0xde   : > { %vm3378_vm7 = vmpackc.low %vm570_vm5, %vm570_vm5  ;;  %v3388_v45 = vpop.f32.mrf.mxu0  ;;  %v2856_v31 = vld [vmem:[%s3882_s3 + $0x424] ss:$12 sps:$4 sm:$0xff]   ;;  %v2865_v37 = vld [vmem:[%s3882_s3 + $0x58c] ss:$12 sps:$4 sm:$0xff]  }
  0xdf   : > { %vm3390_vm8 = vmpackc.low %vm572_vm6, %vm572_vm6  ;;  %2524 = vmatprep.mubr.msk.bf16.mxu0 %vm3378_vm7, %v3011_v47 }
  0xe0   : > { %2528 = vmatprep.mubr.msk.bf16.mxu1 %vm3390_vm8, %v3011_v47  ;;  %2526 = vmatmul.mubr.msk.bf16.vlgmr.msra.gmra.mxu0 %vm3366_vm3, %v3011_v47  ;;  %v3407_v50 = vpop.f32.mrf.mxu1  ;;  %v453_v51 = vpop.f32.mrf.mxu0 }
  0xe1   : > { %2530 = vmatmul.mubr.msk.bf16.vlgmr.msra.gmra.mxu1 %vm3370_vm4, %v3011_v47  ;;  %1956 = vmatpush1.bf16.msra.mxu0 %v2788_v40  ;;  %vm574_vm9 = vcmp.eq.f32.partialorder %v453_v51, %v552_v41  ;;  %v2863_v40 = vld [vmem:[%s3882_s3 + $0x588] ss:$12 sps:$4 sm:$0xff]  }
  0xe2   : > { %1997 = vmatpush1.bf16.msra.mxu1 %v2791_v43  ;;  %1957 = vmatprep.subr.bf16.mxu0 %v2796_v44  ;;  %v524_v55 = vpop.f32.mrf.mxu1  ;;  %vm3424_vm10 = vmpackc.low %vm574_vm9, %vm574_vm9  ;;  %v2868_v41 = vld [vmem:[%s3882_s3 + $0x3f4] ss:$12 sps:$4 sm:$0xff]   ;;  %v2866_v44 = vld [vmem:[%s3882_s3 + $0x3f0] ss:$12 sps:$4 sm:$0xff]  }
  0xe3   : > { %1998 = vmatprep.subr.bf16.mxu1 %v2799_v48  ;;  %vm576_vm11 = vcmp.eq.f32.partialorder %v524_v55, %v560_v49  ;;  %2532 = vmatprep.mubr.msk.bf16.mxu0 %vm3424_vm10, %v3011_v47  ;;  %v2871_v43 = vld [vmem:[%s3882_s3 + $0x574] ss:$12 sps:$4 sm:$0xff]   ;;  %v2869_v48 = vld [vmem:[%s3882_s3 + $0x570] ss:$12 sps:$4 sm:$0xff]   ;;  %v2875_v55 = vld [vmem:[%s3882_s3 + $0x558] ss:$12 sps:$4 sm:$0xff]  }
  0xe4   : > { %vm3428_vm12 = vmpackc.low %vm576_vm11, %vm576_vm11  ;;  %v2874_v49 = vld [vmem:[%s3882_s3 + $0x3dc] ss:$12 sps:$4 sm:$0xff]  }
  0xe5   : > { %1958 = vmatpush1.bf16.msra.mxu0 %v2794_v52  ;;  %2536 = vmatprep.mubr.msk.bf16.mxu1 %vm3428_vm12, %v3011_v47  ;;  %v2877_v51 = vld [vmem:[%s3882_s3 + $0x55c] ss:$12 sps:$4 sm:$0xff]   ;;  %v555_v52 = vsub.s32 6, %v3349_v22 }
  0xe6   : > { %1999 = vmatpush1.bf16.msra.mxu1 %v2797_v53  ;;  %1959 = vmatprep.subr.bf16.mxu0 %v2802_v54  ;;  %v547_v53 = vsub.s32 4, %v3349_v22  ;;  %v2872_v54 = vld [vmem:[%s3882_s3 + $0x3d8] ss:$12 sps:$4 sm:$0xff]  }
  0xe7   : > { %2000 = vmatprep.subr.bf16.mxu1 %v2805_v56  ;;  %v2880_v56 = vld [vmem:[%s3882_s3 + $0x3c4] ss:$12 sps:$4 sm:$0xff]  }
  0xe8   : > { %v2883_v22 = vld [vmem:[%s3882_s3 + $0x544] ss:$12 sps:$4 sm:$0xff]  }
  0xe9   : > { %1960 = vmatpush1.bf16.msra.mxu0 %v2800_v59  ;;  %v556_v59 = vrot.slane %v3356_v25, %v555_v52  ;;  %v2935_v52 = vld [vmem:[%s3882_s3 + $0x4d0] ss:$12 sps:$4 sm:$0xff]  }
  0xea   : > { %2001 = vmatpush1.bf16.msra.mxu1 %v2803_v60  ;;  %1961 = vmatprep.subr.bf16.mxu0 %v2808_v61  ;;  %v548_v60 = vrot.slane %v3356_v25, %v547_v53  ;;  %v2878_v61 = vld [vmem:[%s3882_s3 + $0x3c0] ss:$12 sps:$4 sm:$0xff]   ;;  %v2885_v25 = vld [vmem:[%s3882_s3 + $0x2f0] ss:$12 sps:$4 sm:$0xff]   ;;  %v2936_v53 = vld [vmem:[%s3882_s3 + $0x3f8] ss:$12 sps:$4 sm:$0xff]  }
  0xeb   : > { %2002 = vmatprep.subr.bf16.mxu1 %v2811_v62  ;;  %v2881_v62 = vld [vmem:[%s3882_s3 + $0x540] ss:$12 sps:$4 sm:$0xff]   ;;  %vm575_vm13 = vcmp.eq.f32.partialorder %v3407_v50, %v556_v59  ;;  %v2887_v50 = vld [vmem:[%s3882_s3 + $0x230] ss:$12 sps:$4 sm:$0xff]  }
  0xec   : > { %vm573_vm14 = vcmp.eq.f32.partialorder %v3388_v45, %v548_v60  ;;  %vm3615_vm15 = vmpackc.low %vm575_vm13, %vm575_vm13  ;;  %v2888_v45 = vld [vmem:[%s3882_s3 + $0x158] ss:$12 sps:$4 sm:$0xff]   ;;  %v2940_v59 = vld [vmem:[%s3882_s3 + $0x3e0] ss:$12 sps:$4 sm:$0xff]  }
  0xed   : > { %1962 = vmatpush1.bf16.msra.mxu0 %v2806_v63  ;;  %v2884_v63 = vld [vmem:[%s3882_s3 + $0x170] ss:$12 sps:$4 sm:$0xff]   ;;  %vm3622_vm0 = vmpackc.low %vm573_vm14, %vm573_vm14  ;;  %v2942_v60 = vld [vmem:[%s3882_s3 + $0x320] ss:$12 sps:$4 sm:$0xff]  }
  0xee   : > { %2003 = vmatpush1.bf16.msra.mxu1 %v2809_v0  ;;  %1963 = vmatprep.subr.bf16.mxu0 %v2814_v1  ;;  %v2886_v0 = vld [vmem:[%s3882_s3 + $0xb0] ss:$12 sps:$4 sm:$0xff]  }
  0xef   : > { %2004 = vmatprep.subr.bf16.mxu1 %v2817_v2 }
  0xf1   : > { %1964 = vmatpush1.bf16.msra.mxu0 %v2812_v3  ;;  %v2889_v3 = vld [vmem:[%s3882_s3 + $0x2d8] ss:$12 sps:$4 sm:$0xff]  }
  0xf2   : > { %2005 = vmatpush1.bf16.msra.mxu1 %v2815_v4  ;;  %1965 = vmatprep.subr.bf16.mxu0 %v2820_v5  ;;  %v2890_v4 = vld [vmem:[%s3882_s3 + $0x98] ss:$12 sps:$4 sm:$0xff]  }
  0xf3   : > { %2006 = vmatprep.subr.bf16.mxu1 %v2823_v6  ;;  %v2891_v5 = vld [vmem:[%s3882_s3 + $0x218] ss:$12 sps:$4 sm:$0xff]   ;;  %v2892_v6 = vld [vmem:[%s3882_s3 + $0x140] ss:$12 sps:$4 sm:$0xff]  }
  0xf5   : > { %1966 = vmatpush1.bf16.msra.mxu0 %v2818_v7  ;;  %v2893_v7 = vld [vmem:[%s3882_s3 + $0x2c0] ss:$12 sps:$4 sm:$0xff]  }
  0xf6   : > { %2007 = vmatpush1.bf16.msra.mxu1 %v2821_v8  ;;  %1967 = vmatprep.subr.bf16.mxu0 %v2826_v9  ;;  %v2895_v8 = vld [vmem:[%s3882_s3 + $0x200] ss:$12 sps:$4 sm:$0xff]   ;;  %v2897_v9 = vld [vmem:[%s3882_s3 + $0x2a8] ss:$12 sps:$4 sm:$0xff]  }
  0xf7   : > { %2008 = vmatprep.subr.bf16.mxu1 %v2829_v10  ;;  %v2898_v10 = vld [vmem:[%s3882_s3 + $0x68] ss:$12 sps:$4 sm:$0xff]  }
  0xf9   : > { %1968 = vmatpush1.bf16.msra.mxu0 %v2824_v11  ;;  %v2899_v11 = vld [vmem:[%s3882_s3 + $0x1e8] ss:$12 sps:$4 sm:$0xff]  }
  0xfa   : > { %2009 = vmatpush1.bf16.msra.mxu1 %v2827_v12  ;;  %1969 = vmatprep.subr.bf16.mxu0 %v2832_v13  ;;  %v2900_v12 = vld [vmem:[%s3882_s3 + $0x110] ss:$12 sps:$4 sm:$0xff]  }
  0xfb   : > { %2010 = vmatprep.subr.bf16.mxu1 %v2835_v14  ;;  %v2901_v13 = vld [vmem:[%s3882_s3 + $0x290] ss:$12 sps:$4 sm:$0xff]  }
  0xfc   : > { %v2902_v14 = vld [vmem:[%s3882_s3 + $0x50] ss:$12 sps:$4 sm:$0xff]  }
  0xfd   : > { %1970 = vmatpush1.bf16.msra.mxu0 %v2830_v15  ;;  %v2903_v15 = vld [vmem:[%s3882_s3 + $0x1d0] ss:$12 sps:$4 sm:$0xff]  }
  0xfe   : > { %2011 = vmatpush1.bf16.msra.mxu1 %v2833_v16  ;;  %1971 = vmatprep.subr.bf16.mxu0 %v2838_v17  ;;  %v2904_v16 = vld [vmem:[%s3882_s3 + $0xf8] ss:$12 sps:$4 sm:$0xff]  }
  0xff   : > { %2012 = vmatprep.subr.bf16.mxu1 %v2841_v18  ;;  %v2905_v17 = vld [vmem:[%s3882_s3 + $0x278] ss:$12 sps:$4 sm:$0xff]  }
 0x100   : > { %v2906_v18 = vld [vmem:[%s3882_s3 + $0x38] ss:$12 sps:$4 sm:$0xff]  }
 0x101   : > { %1972 = vmatpush2.bf16.msra.mxu0 %v2836_v19  ;;  %v2907_v19 = vld [vmem:[%s3882_s3 + $0x1b8] ss:$12 sps:$4 sm:$0xff]  }
 0x102   : > { %2013 = vmatpush2.bf16.msra.mxu1 %v2839_v20  ;;  %1973 = vmatprep.subr.bf16.mxu0 %v2844_v21  ;;  %v2908_v20 = vld [vmem:[%s3882_s3 + $0xe0] ss:$12 sps:$4 sm:$0xff]  }
 0x103   : > { %2014 = vmatprep.subr.bf16.mxu1 %v2847_v23  ;;  %v2909_v21 = vld [vmem:[%s3882_s3 + $0x260] ss:$12 sps:$4 sm:$0xff]  }
 0x104   : > { %v2910_v23 = vld [vmem:[%s3882_s3 + $0x20] ss:$12 sps:$4 sm:$0xff]  }
 0x105   : > { %1974 = vmatpush2.bf16.msra.mxu0 %v2842_v24  ;;  %v2911_v24 = vld [vmem:[%s3882_s3 + $0x1a0] ss:$12 sps:$4 sm:$0xff]  }
 0x106   : > { %2015 = vmatpush2.bf16.msra.mxu1 %v2845_v26  ;;  %1975 = vmatprep.subr.bf16.mxu0 %v2850_v27  ;;  %v2912_v26 = vld [vmem:[%s3882_s3 + $0xc8] ss:$12 sps:$4 sm:$0xff]  }
 0x107   : > { %2016 = vmatprep.subr.bf16.mxu1 %v2853_v28  ;;  %v2913_v27 = vld [vmem:[%s3882_s3 + $0x248] ss:$12 sps:$4 sm:$0xff]  }
 0x108   : > { %v2914_v28 = vld [vmem:[%s3882_s3 + $0x8] ss:$12 sps:$4 sm:$0xff]  }
 0x109   : > { %1976 = vmatpush2.bf16.msra.mxu0 %v2848_v29  ;;  %v2915_v29 = vld [vmem:[%s3882_s3 + $0x188] ss:$12 sps:$4 sm:$0xff]  }
 0x10a   : > { %2017 = vmatpush2.bf16.msra.mxu1 %v2851_v30  ;;  %1977 = vmatprep.subr.bf16.mxu0 %v2856_v31  ;;  %v2916_v30 = vld [vmem:[%s3882_s3 + $0x470] ss:$12 sps:$4 sm:$0xff]  }
 0x10b   : > { %2018 = vmatprep.subr.bf16.mxu1 %v2859_v32  ;;  %v2917_v31 = vld [vmem:[%s3882_s3 + $0x5f0] ss:$12 sps:$4 sm:$0xff]  }
 0x10c   : > { %v2918_v32 = vld [vmem:[%s3882_s3 + $0x3b0] ss:$12 sps:$4 sm:$0xff]  }
 0x10d   : > { %1978 = vmatpush2.bf16.msra.mxu0 %v2854_v33  ;;  %v2919_v33 = vld [vmem:[%s3882_s3 + $0x530] ss:$12 sps:$4 sm:$0xff]  }
 0x10e   : > { %2019 = vmatpush2.bf16.msra.mxu1 %v2857_v34  ;;  %1979 = vmatprep.subr.bf16.mxu0 %v2862_v35  ;;  %v2920_v34 = vld [vmem:[%s3882_s3 + $0x458] ss:$12 sps:$4 sm:$0xff]  }
 0x10f   : > { %2020 = vmatprep.subr.bf16.mxu1 %v2865_v37  ;;  %v2921_v35 = vld [vmem:[%s3882_s3 + $0x5d8] ss:$12 sps:$4 sm:$0xff]  }
 0x110   : > { %v2922_v37 = vld [vmem:[%s3882_s3 + $0x398] ss:$12 sps:$4 sm:$0xff]  }
 0x111   : > { %1980 = vmatpush2.bf16.msra.mxu0 %v2860_v38  ;;  %v2924_v38 = vld [vmem:[%s3882_s3 + $0x440] ss:$12 sps:$4 sm:$0xff]  }
 0x112   : > { %2021 = vmatpush2.bf16.msra.mxu1 %v2863_v40  ;;  %1981 = vmatprep.subr.bf16.mxu0 %v2868_v41  ;;  %v2927_v40 = vld [vmem:[%s3882_s3 + $0x500] ss:$12 sps:$4 sm:$0xff]   ;;  %v2929_v41 = vld [vmem:[%s3882_s3 + $0x5a8] ss:$12 sps:$4 sm:$0xff]  }
 0x113   : > { %2022 = vmatprep.subr.bf16.mxu1 %v2871_v43  ;;  %v2930_v43 = vld [vmem:[%s3882_s3 + $0x368] ss:$12 sps:$4 sm:$0xff]  }
 0x115   : > { %1982 = vmatpush2.bf16.msra.mxu0 %v2866_v44  ;;  %v2931_v44 = vld [vmem:[%s3882_s3 + $0x4e8] ss:$12 sps:$4 sm:$0xff]  }
 0x116   : > { %2023 = vmatpush2.bf16.msra.mxu1 %v2869_v48  ;;  %1983 = vmatprep.subr.bf16.mxu0 %v2874_v49  ;;  %v2932_v48 = vld [vmem:[%s3882_s3 + $0x410] ss:$12 sps:$4 sm:$0xff]  }
 0x117   : > { %2024 = vmatprep.subr.bf16.mxu1 %v2877_v51  ;;  %v2933_v49 = vld [vmem:[%s3882_s3 + $0x590] ss:$12 sps:$4 sm:$0xff]  }
 0x118   : > { %v2934_v51 = vld [vmem:[%s3882_s3 + $0x350] ss:$12 sps:$4 sm:$0xff]  }
 0x119   : > { %1984 = vmatpush2.bf16.msra.mxu0 %v2872_v54  ;;  %v2937_v54 = vld [vmem:[%s3882_s3 + $0x578] ss:$12 sps:$4 sm:$0xff]  }
 0x11a   : > { %2025 = vmatpush2.bf16.msra.mxu1 %v2875_v55  ;;  %1985 = vmatprep.subr.bf16.mxu0 %v2880_v56  ;;  %v2938_v55 = vld [vmem:[%s3882_s3 + $0x338] ss:$12 sps:$4 sm:$0xff]  }
 0x11b   : > { %2026 = vmatprep.subr.bf16.mxu1 %v2883_v22  ;;  %v2939_v56 = vld [vmem:[%s3882_s3 + $0x4b8] ss:$12 sps:$4 sm:$0xff]   ;;  %v2941_v22 = vld [vmem:[%s3882_s3 + $0x560] ss:$12 sps:$4 sm:$0xff]  }
 0x11d   : > { %1986 = vmatpush2.bf16.msra.mxu0 %v2878_v61  ;;  %v2943_v61 = vld [vmem:[%s3882_s3 + $0x4a0] ss:$12 sps:$4 sm:$0xff]  }
 0x11e   : > { %2027 = vmatpush2.bf16.msra.mxu1 %v2881_v62  ;;  %2560 = vmatprep.subr.bf16.mxu0 %v2884_v63  ;;  %v2944_v62 = vld [vmem:[%s3882_s3 + $0x3c8] ss:$12 sps:$4 sm:$0xff]  }
 0x11f   : > { %2582 = vmatprep.subr.bf16.mxu1 %v2885_v25  ;;  %v2945_v63 = vld [vmem:[%s3882_s3 + $0x548] ss:$12 sps:$4 sm:$0xff]  }
 0x120   : > { %2534 = vmatmul.mubr.msk.bf16.vlgmr.msra.gmra.mxu0 %vm3622_vm0, %v3011_v47  ;;  %v2946_v25 = vld [vmem:[%s3882_s3 + $0x308] ss:$12 sps:$4 sm:$0xff]  }
 0x121   : > { %2538 = vmatmul.mubr.msk.bf16.vlgmr.msra.gmra.mxu1 %vm3615_vm15, %v3011_v47  ;;  %2561 = vmatpush3.bf16.msra.mxu0 %v2886_v0  ;;  %v2947_v0 = vld [vmem:[%s3882_s3 + $0x488] ss:$12 sps:$4 sm:$0xff]  }
 0x122   : > { %2540 = vmatprep.mubr.msk.bf16.mxu0 %vm3378_vm7, %v3011_v47  ;;  %2583 = vmatpush3.bf16.msra.mxu1 %v2887_v50 }
 0x123   : > { %2544 = vmatprep.mubr.msk.bf16.mxu1 %vm3390_vm8, %v3011_v47  ;;  %2562 = vmatprep.subr.bf16.mxu0 %v2888_v45 }
 0x124   : > { %2584 = vmatprep.subr.bf16.mxu1 %v2889_v3 }
 0x125   : > { %2563 = vmatpush3.bf16.msra.mxu0 %v2890_v4 }
 0x126   : > { %2585 = vmatpush3.bf16.msra.mxu1 %v2891_v5  ;;  %2564 = vmatprep.subr.bf16.mxu0 %v2892_v6 }
 0x127   : > { %2586 = vmatprep.subr.bf16.mxu1 %v2893_v7 }
 0x129   : > { %2565 = vmatpush3.bf16.msra.mxu0 %v2894_v42 }
 0x12a   : > { %2587 = vmatpush3.bf16.msra.mxu1 %v2895_v8  ;;  %2566 = vmatprep.subr.bf16.mxu0 %v2896_v46 }
 0x12b   : > { %2588 = vmatprep.subr.bf16.mxu1 %v2897_v9 }
 0x12d   : > { %2567 = vmatpush3.bf16.msra.mxu0 %v2898_v10 }
 0x12e   : > { %2589 = vmatpush3.bf16.msra.mxu1 %v2899_v11  ;;  %2568 = vmatprep.subr.bf16.mxu0 %v2900_v12 }
 0x12f   : > { %2590 = vmatprep.subr.bf16.mxu1 %v2901_v13 }
 0x131   : > { %2569 = vmatpush3.bf16.msra.mxu0 %v2902_v14 }
 0x132   : > { %2591 = vmatpush3.bf16.msra.mxu1 %v2903_v15  ;;  %2570 = vmatprep.subr.bf16.mxu0 %v2904_v16 }
 0x133   : > { %2592 = vmatprep.subr.bf16.mxu1 %v2905_v17 }
 0x135   : > { %2571 = vmatpush3.bf16.msra.mxu0 %v2906_v18 }
 0x136   : > { %2593 = vmatpush3.bf16.msra.mxu1 %v2907_v19  ;;  %2572 = vmatprep.subr.bf16.mxu0 %v2908_v20 }
 0x137   : > { %2594 = vmatprep.subr.bf16.mxu1 %v2909_v21 }
 0x139   : > { %2573 = vmatpush3.bf16.msra.mxu0 %v2910_v23 }
 0x13a   : > { %2595 = vmatpush3.bf16.msra.mxu1 %v2911_v24  ;;  %2574 = vmatprep.subr.bf16.mxu0 %v2912_v26 }
 0x13b   : > { %2596 = vmatprep.subr.bf16.mxu1 %v2913_v27 }
 0x13d   : > { %2575 = vmatpush3.bf16.msra.mxu0 %v2914_v28 }
 0x13e   : > { %2597 = vmatpush3.bf16.msra.mxu1 %v2915_v29  ;;  %2604 = vmatprep.subr.bf16.mxu0 %v2916_v30 }
 0x13f   : > { %2626 = vmatprep.subr.bf16.mxu1 %v2917_v31 }
 0x140   : > { %2542 = vmatmul.mubr.msk.bf16.vlgmr.msra.gmra.mxu0 %vm3366_vm3, %v3011_v47 }
 0x141   : > { %2546 = vmatmul.mubr.msk.bf16.vlgmr.msra.gmra.mxu1 %vm3370_vm4, %v3011_v47  ;;  %2605 = vmatpush3.bf16.msra.mxu0 %v2918_v32 }
 0x142   : > { %2548 = vmatprep.mubr.msk.bf16.mxu0 %vm3424_vm10, %v3011_v47  ;;  %2627 = vmatpush3.bf16.msra.mxu1 %v2919_v33 }
 0x143   : > { %2552 = vmatprep.mubr.msk.bf16.mxu1 %vm3428_vm12, %v3011_v47  ;;  %2606 = vmatprep.subr.bf16.mxu0 %v2920_v34 }
 0x144   : > { %2628 = vmatprep.subr.bf16.mxu1 %v2921_v35 }
 0x145   : > { %2607 = vmatpush3.bf16.msra.mxu0 %v2922_v37 }
 0x146   : > { %2629 = vmatpush3.bf16.msra.mxu1 %v2923_v36  ;;  %2608 = vmatprep.subr.bf16.mxu0 %v2924_v38 }
 0x147   : > { %2630 = vmatprep.subr.bf16.mxu1 %v2925_v39 }
 0x149   : > { %2609 = vmatpush3.bf16.msra.mxu0 %v2926_v57 }
 0x14a   : > { %2631 = vmatpush3.bf16.msra.mxu1 %v2927_v40  ;;  %2610 = vmatprep.subr.bf16.mxu0 %v2928_v58 }
 0x14b   : > { %2632 = vmatprep.subr.bf16.mxu1 %v2929_v41 }
 0x14d   : > { %2611 = vmatpush3.bf16.msra.mxu0 %v2930_v43 }
 0x14e   : > { %2633 = vmatpush3.bf16.msra.mxu1 %v2931_v44  ;;  %2612 = vmatprep.subr.bf16.mxu0 %v2932_v48 }
 0x14f   : > { %2634 = vmatprep.subr.bf16.mxu1 %v2933_v49 }
 0x151   : > { %2613 = vmatpush3.bf16.msra.mxu0 %v2934_v51 }
 0x152   : > { %2635 = vmatpush3.bf16.msra.mxu1 %v2935_v52  ;;  %2614 = vmatprep.subr.bf16.mxu0 %v2936_v53 }
 0x153   : > { %2636 = vmatprep.subr.bf16.mxu1 %v2937_v54 }
 0x155   : > { %2615 = vmatpush3.bf16.msra.mxu0 %v2938_v55 }
 0x156   : > { %2637 = vmatpush3.bf16.msra.mxu1 %v2939_v56  ;;  %2616 = vmatprep.subr.bf16.mxu0 %v2940_v59 }
 0x157   : > { %2638 = vmatprep.subr.bf16.mxu1 %v2941_v22 }
 0x159   : > { %2617 = vmatpush3.bf16.msra.mxu0 %v2942_v60 }
 0x15a   : > { %2639 = vmatpush3.bf16.msra.mxu1 %v2943_v61  ;;  %2618 = vmatprep.subr.bf16.mxu0 %v2944_v62 }
 0x15b   : > { %2640 = vmatprep.subr.bf16.mxu1 %v2945_v63 }
 0x15d   : > { %2619 = vmatpush3.bf16.msra.mxu0 %v2946_v25 }
 0x15e   : > { %2641 = vmatpush3.bf16.msra.mxu1 %v2947_v0  ;;  %v2555_v0 = vld [vmem:[%s3883_s4] ss:$0 sm:$0xff] }
 0x160   : > { %2550 = vmatmul.mubr.msk.bf16.vlgmr.msra.gmra.mxu0 %vm3622_vm0, %v3011_v47 }
 0x161   : > { %2554 = vmatmul.mubr.msk.bf16.vlgmr.msra.gmra.mxu1 %vm3615_vm15, %v3011_v47 }
 0x1a0   : > { %v1907_v50 = vpop.f32.mrf.mxu0 }
 0x1a1   : > { %v1948_v45 = vpop.f32.mrf.mxu1 }
 0x1a2   : > { %v1909_v3 = vpop.f32.mrf.mxu0  ;;  %v1949_v8 = vadd.f32 %v1948_v45, %v1907_v50 }
 0x1a3   : > { %v1950_v4 = vpop.f32.mrf.mxu1 }
 0x1a4   : > { %v1911_v5 = vpop.f32.mrf.mxu0  ;;  %v1951_v9 = vadd.f32 %v1950_v4, %v1909_v3 }
 0x1a5   : > { %v1952_v6 = vpop.f32.mrf.mxu1 }
 0x1a6   : > { %v1912_v7 = vpop.f32.mrf.mxu0 }
 0x1a7   : > { %v1953_v42 = vpop.f32.mrf.mxu1 }
 0x1e0   : > { %v1989_v46 = vpop.f32.mrf.mxu0 }
 0x1e1   : > { %v1990_v10 = vadd.f32 %v1989_v46, %v1949_v8  ;;  %v2030_v11 = vpop.f32.mrf.mxu1 }
 0x1e2   : > { %v1991_v12 = vpop.f32.mrf.mxu0 }
 0x1e3   : > { %v2031_v2 = vadd.f32 %v2030_v11, %v1990_v10  ;;  %v1992_v13 = vadd.f32 %v1991_v12, %v1951_v9  ;;  %v2032_v14 = vpop.f32.mrf.mxu1 }
 0x1e4   : > { %v1993_v15 = vpop.f32.mrf.mxu0 }
 0x1e5   : > { %v2034_v1 = vpop.f32.mrf.mxu1  ;;  %2206 = vrot.lane.b32.xlu1 %v2031_v2, %s3012_s12  ;;  %2198 = vrot.lane.b32.xlu0 %v2031_v2, %s3013_s13  ;;  %v2033_v16 = vadd.f32 %v2032_v14, %v1992_v13 }
 0x1e6   : > { %v1994_v47 = vpop.f32.mrf.mxu0 }
 0x1e7   : > { %v2035_v17 = vpop.f32.mrf.mxu1 }
 0x1e9   : > { %2212 = vrot.lane.b32.xlu1 %v2033_v16, %s3013_s13  ;;  %2202 = vrot.lane.b32.xlu0 %v2031_v2, %s3014_s14 }
 0x1ed   : > { %2220 = vrot.lane.b32.xlu1 %v2033_v16, %s3012_s12  ;;  %2216 = vrot.lane.b32.xlu0 %v2033_v16, %s3014_s14 }
 0x200   : > { %v2576_v18 = vpop.f32.mrf.mxu0 }
 0x201   : > { %v2598_v19 = vpop.f32.mrf.mxu1 }
 0x202   : > { %v2577_v20 = vpop.f32.mrf.mxu0 }
 0x203   : > { %v2599_v21 = vpop.f32.mrf.mxu1  ;;  %v2578_v28 = vadd.f32 %v2577_v20, %v2576_v18 }
 0x204   : > { %v2579_v23 = vpop.f32.mrf.mxu0  ;;  %v2600_v29 = vadd.f32 %v2599_v21, %v2598_v19 }
 0x205   : > { %v2601_v24 = vpop.f32.mrf.mxu1 }
 0x206   : > { %v2580_v26 = vpop.f32.mrf.mxu0  ;;  %v2112_v33 = vadd.f32 %v2600_v29, %v2578_v28 }
 0x207   : > { %v2602_v27 = vpop.f32.mrf.mxu1 }
 0x220   : > { %v2620_v30 = vpop.f32.mrf.mxu0 }
 0x221   : > { %v2642_v31 = vpop.f32.mrf.mxu1 }
 0x222   : > { %v2621_v32 = vpop.f32.mrf.mxu0 }
 0x223   : > { %v2622_v34 = vadd.f32 %v2621_v32, %v2620_v30  ;;  %v2643_v35 = vpop.f32.mrf.mxu1 }
 0x224   : > { %v2623_v37 = vpop.f32.mrf.mxu0  ;;  %v2644_v38 = vadd.f32 %v2643_v35, %v2642_v31 }
 0x225   : > { %v2152_v36 = vadd.f32 %v2622_v34, %v2112_v33  ;;  %v2645_v39 = vpop.f32.mrf.mxu1 }
 0x226   : > { %v2624_v57 = vpop.f32.mrf.mxu0 }
 0x227   : > { %v2192_v40 = vadd.f32 %v2644_v38, %v2152_v36  ;;  %v2646_v58 = vpop.f32.mrf.mxu1 }
 0x229   : > { %2230 = vrot.lane.b32.xlu1 %v2192_v40, %s3014_s14  ;;  %2226 = vrot.lane.b32.xlu0 %v2192_v40, %s3013_s13 }
 0x22d   : > { %2234 = vrot.lane.b32.xlu0 %v2192_v40, %s3012_s12  ;;  %s2952_s12 = sshll.u32 %s3015_s11, 4  ;;  %s2953_s12 = int_to_ptr.vmem [resolvable:$false] %s2952_s12 }
 0x22e   : > { %s2954_s22 = scalar_lea.vmem %s2953_s12, 256  ;;  %p2955_p0 = scmp.lt.s32.totalorder %s2263_s30, %s2953_s12 }
 0x22f   : > { %p2956_p1 = scmp.lt.s32.totalorder %s2954_s22, %s2948_s10 }
 0x231   : > { %p2957_p2 = por %p2956_p1, %p2955_p0 }
 0x233   : > { %p2958_p3 = pnand %p2957_p2, %p2951_p13 }
 0x257   : > { %v2199_v41 = vpop.permute.xlu0 %2198  ;;  %v2207_v49 = vpop.permute.xlu1 %2206 }
 0x258   : > { %v2201_v44 = vmax.f32 %v2031_v2, %v2199_v41 }
 0x25b   : > { %v2203_v43 = vpop.permute.xlu0 %2202  ;;  %v2213_v53 = vpop.permute.xlu1 %2212 }
 0x25c   : > { %v2205_v48 = vmax.f32 %v2201_v44, %v2203_v43 }
 0x25e   : > { %v2209_v51 = vmax.f32 %v2205_v48, %v2207_v49 }
 0x25f   : > { %v2217_v55 = vpop.permute.xlu0 %2216  ;;  %v2221_v59 = vpop.permute.xlu1 %2220 }
 0x260   : > { %v2210_v52 = vmax.f32 %v2209_v51, %v2033_v16 }
 0x262   : > { %v2215_v54 = vmax.f32 %v2210_v52, %v2213_v53 }
 0x264   : > { %v2219_v56 = vmax.f32 %v2215_v54, %v2217_v55 }
 0x266   : > { %v2223_v22 = vmax.f32 %v2219_v56, %v2221_v59 }
 0x268   : > { %v2224_v60 = vmax.f32 %v2223_v22, %v2192_v40 }
 0x29b   : > { %v2227_v61 = vpop.permute.xlu0 %2226  ;;  %v2231_v63 = vpop.permute.xlu1 %2230 }
 0x29c   : > { %v2229_v62 = vmax.f32 %v2224_v60, %v2227_v61 }
 0x29e   : > { %v2233_v25 = vmax.f32 %v2229_v62, %v2231_v63 }
 0x29f   : > { %v2235_v50 = vpop.permute.xlu0 %2234 }
 0x2a0   : > { %v2237_v45 = vmax.f32 %v2233_v25, %v2235_v50 }
 0x2a2   : > { %v2245_v3 = vadd.f32 %v2555_v0, %v2237_v45 }
 0x2a4   : > { %2247 = vst.msk [vmem:[%s215_s26] sm:$0xff] %vm2246_vm1, %v2245_v3 }
 0x2a5   : > { %2961 = shalt.err (!%p2958_p3)
}
 0x2a6   : > { %s2962_s13 = scalar_lea.hbm %s2260_s8, 128  ;;  %s2966_s16 = scalar_lea.hbm %s3884_s5, 256 }
 0x2a7   : > { %p2963_p4 = scmp.ne.s32.totalorder %s2260_s8, %s2962_s13  ;;  %p2967_p9 = scmp.lt.s32.totalorder %s2260_s8, %s3884_s5 }
 0x2a8   : > { %p2968_p10 = scmp.lt.s32.totalorder %s2966_s16, %s2962_s13 }
 0x2a9   : > { %p2964_p7 = pnand %p2963_p4, %p3084_p5 }
 0x2aa   : > { %p2969_p11 = por %p2968_p10, %p2967_p9 }
 0x2ab   : > { %p2965_p8 = pneg %p2964_p7 }
 0x2ad   : > { %p2970_p12 = pnand %p2969_p11, %p2965_p8 }
 0x2af   : > { %2973 = shalt.err (!%p2970_p12)
}
 0x2b0   : > { %2648 = dma.vmem_to_hbm [thread:$0]  (%p3084_p5), %s2263_s30, 128, %s2260_s8, %s2249_s9  }
 0x2b1 PF: > { %p2654_p13 = scmp.ge.s32.totalorder %s3008_s21, 2  ;;  %s2274_s25 = sand.u32 1, %s2996_s18  }
 0x2b2   : > { %s2275_s26 = scalar_lea.sflag [#allocation3], %s2274_s25 }
 0x2b3   : > { %p2651_p0 = pnand %p2654_p13, %p3088_p6 }
 0x2b5   : > { %p2652_p1 = pneg %p2651_p0 }
 0x2b7   : > { %2991 = dma.done.wait (%p2652_p1), %s2275_s26, 128  }
 0x2b8   : > { %2993 = vsyncadd (%p2652_p1), %s2275_s26, 4294967168  ;;  %p15_p2 = scmp.ge.s32.totalorder %s3071_s24, 4   ;;  %s3903_s18 = smov %s3000_s19 }
 0x2b9   : > { %s3904_s19 = smov %s3004_s20  ;;  %s3905_s20 = smov %s3082_s27 }
 0x2ba   : > { %s3906_s21 = smov %s3071_s24  ;;  %17 = sbr.rel (!%p15_p2) target bundleno = 3 (0x3), region = 75 }
 0x2bf   :  { %2280 = vsyncpa [#allocation3], 1 }
 0x2c0   :  { %2282 = vsyncpa [#allocation3 + $0x1], 1 }

</bundles_post_ra>
